<compile_context>
chip_gen: v7x
topology: tpu7x:2x2x1
jax: 0.10.0
libtpu: 0.0.40
codegen_flags: <defaults>
</compile_context>

<pallas_src>
import functools

import jax
import jax.numpy as jnp
from jax import lax
from jax.experimental import pallas as pl
from jax.experimental.pallas import tpu as pltpu

_EPS = 1e-12      # ATen cosine_embedding_loss epsilon (added to squared norms)
_LANE = 128
_SUB = 8


def _cdiv(a, b):
    return -(-a // b)


def _round_up(x, m):
    return _cdiv(x, m) * m


# ---------------------------------------------------------------------------
# Kernel bodies
# ---------------------------------------------------------------------------
def _block_cos_loss(slab_ref, num_coords):
    """(1 - cos(pred, target)) for one lane-dense block.

    slab_ref: (2, C, block_rows, 128) VMEM ref; [0]=pred, [1]=target.
    Returns (block_rows, 128) float32.
    """
    dot = p2 = t2 = None
    for ci in range(num_coords):                  # static unroll over tiny C
        pc = slab_ref[0, ci].astype(jnp.float32)
        tc = slab_ref[1, ci].astype(jnp.float32)
        if ci == 0:
            dot, p2, t2 = pc * tc, pc * pc, tc * tc
        else:
            dot = dot + pc * tc
            p2 = p2 + pc * pc
            t2 = t2 + tc * tc
    # Two rsqrt's (EUP slot, ~free) instead of rsqrt(p2*t2): avoids overflow
    # of the product of squared norms for very large vectors.
    cos = dot * lax.rsqrt(p2 + _EPS) * lax.rsqrt(t2 + _EPS)
    return 1.0 - cos


def _partial_rowsum(x):
    """(block_rows, 128) -> (8, 128) partial sums via tile-aligned slices."""
    part = x[0:_SUB, :]
    for j in range(_SUB, x.shape[0], _SUB):
        part = part + x[j:j + _SUB, :]
    return part


def _mean_kernel_w(slab_ref, w_ref, out_ref, *, num_coords):
    """Sum path with an explicit weight stream (zero-padding masks pad lanes)."""
    i = pl.program_id(1)

    @pl.when(i == 0)
    def _init():
        out_ref[...] = jnp.zeros_like(out_ref)

    loss = _block_cos_loss(slab_ref, num_coords) * w_ref[...].astype(jnp.float32)
    out_ref[...] += _partial_rowsum(loss)


def _mean_kernel_nw(slab_ref, out_ref, *, num_coords, block_rows, valid_points):
    """Sum path with no weight stream: padding masked in-kernel from iota."""
    o = pl.program_id(0)
    i = pl.program_id(1)

    @pl.when(i == 0)
    def _init():
        out_ref[...] = jnp.zeros_like(out_ref)

    loss = _block_cos_loss(slab_ref, num_coords)
    blk = o * pl.num_programs(1) + i
    row = lax.broadcasted_iota(jnp.int32, loss.shape, 0)
    lane = lax.broadcasted_iota(jnp.int32, loss.shape, 1)
    point = (blk * block_rows + row) * _LANE + lane
    loss = jnp.where(point < valid_points, loss, 0.0)
    out_ref[...] += _partial_rowsum(loss)


def _none_kernel_w(slab_ref, w_ref, loss_ref, *, num_coords, loss_weight):
    loss = _block_cos_loss(slab_ref, num_coords) * w_ref[...].astype(jnp.float32)
    if loss_weight != 1.0:
        loss = loss * loss_weight
    loss_ref[...] = loss


def _none_kernel_nw(slab_ref, loss_ref, *, num_coords, loss_weight):
    loss = _block_cos_loss(slab_ref, num_coords)
    if loss_weight != 1.0:
        loss = loss * loss_weight
    loss_ref[...] = loss


# ---------------------------------------------------------------------------
# Wrapper-side layout plumbing
# ---------------------------------------------------------------------------
def _plan(rows, max_block_rows, n_outer, sub):
    """Choose a row tile that (a) is large, (b) divides the padded row count
    evenly across n_outer * n_inner blocks, keeping padding minimal."""
    max_br = max(sub, _round_up(max_block_rows, sub))
    blocks = _round_up(max(1, _cdiv(rows, max_br)), n_outer)
    block_rows = _round_up(_cdiv(rows, blocks), sub)
    rows_pad = blocks * block_rows
    return block_rows, blocks, rows_pad


def _make_slab(pred, target, rows_pad):
    """(N,D,C) pred/target -> single stacked lane-dense slab (2,C,rows_pad,128).

    Keeps the input dtype (bf16/f16 stream at half width); one fused
    stack+transpose+pad+reshape pass in XLA.
    """
    n, d, c = pred.shape
    r = n * d
    x = jnp.stack([pred.reshape(r, c), target.reshape(r, c)])   # (2, r, C)
    x = jnp.swapaxes(x, 1, 2)                                    # (2, C, r)
    x = jnp.pad(x, ((0, 0), (0, 0), (0, rows_pad * _LANE - r)))
    return x.reshape(2, c, rows_pad, _LANE)


def _make_weight_slab(weight, rows_pad):
    """(N,D) weight -> zero-padded (rows_pad, 128) f32 slab (pad mask folded in)."""
    r = weight.size
    w = jnp.pad(weight.astype(jnp.float32).reshape(r), (0, rows_pad * _LANE - r))
    return w.reshape(rows_pad, _LANE)


def _vmem_limit(block_rows, num_coords, itemsize, has_weight):
    step = block_rows * _LANE * (2 * num_coords * itemsize + (4 if has_weight else 0))
    est = 2 * step + 8 * block_rows * _LANE * 4 + (2 << 20)
    return int(min(max(est, 32 << 20), 48 << 20))


# ---------------------------------------------------------------------------
# Public entry points
# ---------------------------------------------------------------------------
def pts_dir_cos_loss(pred, target, weight=None, reduction='mean',
                     avg_factor=None, loss_weight=1.0, max_block_rows=2048):
    """JAX/Pallas equivalent of loss_weight * pts_dir_cos_loss(...)."""
    assert reduction in ('none', 'mean', 'sum')

    # Mirrors custom_weight_dir_reduce_loss's validation (avg_factor required,
    # 'sum' rejected), exactly as in the original module.
    if avg_factor is None:
        raise ValueError('avg_factor should not be none for PtsDirCosLoss')
    if reduction not in ('mean', 'none'):
        raise ValueError('avg_factor can not be used with reduction="sum"')

    if target.size == 0:
        # TODO(synk): empty-target path (pred.sum() * 0) kept in plain JAX.
        base = jnp.sum(pred).astype(jnp.float32) * 0.0
        if reduction == 'mean':
            return loss_weight * base / jnp.asarray(avg_factor, jnp.float32)
        return loss_weight * base

    n, d, c = pred.shape
    r = n * d
    rows = max(1, _cdiv(r, _LANE))

    slab_dtype = jnp.promote_types(pred.dtype, target.dtype)
    if not jnp.issubdtype(slab_dtype, jnp.floating):
        slab_dtype = jnp.float32
    pred = pred.astype(slab_dtype)
    target = target.astype(slab_dtype)
    itemsize = jnp.dtype(slab_dtype).itemsize
    sub = max(_SUB, 32 // itemsize)          # sublane granularity for the slab dtype
    has_weight = weight is not None
    static_lw = isinstance(loss_weight, (int, float))

    if reduction == 'mean':
        # Leading "parallel" grid axis -> both TensorCores on v7x; per-core
        # (8,128) partial sums, finished with a tiny jnp.sum in the wrapper.
        n_outer = 2 if rows >= 2 * sub else 1
        block_rows, blocks, rows_pad = _plan(rows, max_block_rows, n_outer, sub)
        n_inner = blocks // n_outer
        slab = _make_slab(pred, target, rows_pad)

        slab_spec = pl.BlockSpec((2, c, block_rows, _LANE),
                                 lambda o, i: (0, 0, o * n_inner + i, 0))
        in_specs = [slab_spec]
        args = [slab]
        if has_weight:
            kern = functools.partial(_mean_kernel_w, num_coords=c)
            in_specs.append(pl.BlockSpec((block_rows, _LANE),
                                         lambda o, i: (o * n_inner + i, 0)))
            args.append(_make_weight_slab(weight, rows_pad))
        else:
            kern = functools.partial(_mean_kernel_nw, num_coords=c,
                                     block_rows=block_rows, valid_points=r)

        partials = pl.pallas_call(
            kern,
            out_shape=jax.ShapeDtypeStruct((n_outer * _SUB, _LANE), jnp.float32),
            grid_spec=pltpu.PrefetchScalarGridSpec(
                num_scalar_prefetch=0,
                grid=(n_outer, n_inner),
                in_specs=in_specs,
                out_specs=pl.BlockSpec((_SUB, _LANE), lambda o, i: (o, 0)),
            ),
            compiler_params=pltpu.CompilerParams(
                dimension_semantics=("parallel", "arbitrary"),
                vmem_limit_bytes=_vmem_limit(block_rows, c, itemsize, has_weight)),
        )(*args)

        scale = (jnp.asarray(loss_weight, jnp.float32)
                 / jnp.asarray(avg_factor, jnp.float32))
        return jnp.sum(partials) * scale

    # reduction == 'none': elementwise lane-dense output.
    block_rows, blocks, rows_pad = _plan(rows, max_block_rows, 1, sub)
    slab = _make_slab(pred, target, rows_pad)
    lw = float(loss_weight) if static_lw else 1.0

    slab_spec = pl.BlockSpec((2, c, block_rows, _LANE), lambda i: (0, 0, i, 0))
    in_specs = [slab_spec]
    args = [slab]
    if has_weight:
        kern = functools.partial(_none_kernel_w, num_coords=c, loss_weight=lw)
        in_specs.append(pl.BlockSpec((block_rows, _LANE), lambda i: (i, 0)))
        args.append(_make_weight_slab(weight, rows_pad))
    else:
        kern = functools.partial(_none_kernel_nw, num_coords=c, loss_weight=lw)

    out = pl.pallas_call(
        kern,
        out_shape=jax.ShapeDtypeStruct((rows_pad, _LANE), jnp.float32),
        grid_spec=pltpu.PrefetchScalarGridSpec(
            num_scalar_prefetch=0,
            grid=(blocks,),
            in_specs=in_specs,
            out_specs=pl.BlockSpec((block_rows, _LANE), lambda i: (i, 0)),
        ),
        compiler_params=pltpu.CompilerParams(
            dimension_semantics=("parallel",),
            vmem_limit_bytes=_vmem_limit(block_rows, c, itemsize, has_weight)),
    )(*args)

    if rows_pad * _LANE == r:
        loss = out.reshape(n, d)                 # pure reshape, no slice copy
    else:
        loss = out.reshape(-1)[:r].reshape(n, d)
    if not static_lw:
        loss = loss * loss_weight
    return loss


class PtsDirCosLoss:
    """Stateless JAX port of the PyTorch PtsDirCosLoss module."""

    def __init__(self, reduction='mean', loss_weight=1.0):
        self.reduction = reduction
        self.loss_weight = loss_weight

    def __call__(self, pred, target, weight=None, avg_factor=None,
                 reduction_override=None):
        assert reduction_override in (None, 'none', 'mean', 'sum')
        reduction = reduction_override if reduction_override else self.reduction
        return pts_dir_cos_loss(pred, target, weight=weight,
                                reduction=reduction, avg_factor=avg_factor,
                                loss_weight=self.loss_weight)


# ---------------------------------------------------------------------------
# Self-test
# ---------------------------------------------------------------------------
def _reference_elem(pred, target, weight=None):
    p = pred.astype(jnp.float32)
    t = target.astype(jnp.float32)
    dot = jnp.sum(p * t, axis=-1)
    p2 = jnp.sum(p * p, axis=-1) + _EPS
    t2 = jnp.sum(t * t, axis=-1) + _EPS
    loss = 1.0 - dot / jnp.sqrt(p2 * t2)
    if weight is not None:
        loss = loss * weight.astype(jnp.float32)
    return loss


if __name__ == "__main__":
    key = jax.random.PRNGKey(0)
    k1, k2, k3, k4, k5, k6 = jax.random.split(key, 6)

    # Small, forward-consistent shapes: [num_samples, num_dir, num_coords].
    n1, d1, c1 = 6, 8, 2
    pred = jax.random.normal(k1, (n1, d1, c1), jnp.float32)
    target = jax.random.normal(k2, (n1, d1, c1), jnp.float32)
    weight = jax.random.uniform(k3, (n1, d1), jnp.float32)
    avg_factor = float(n1 * d1)
    loss_weight = 2.0

    loss_mod = PtsDirCosLoss(reduction='mean', loss_weight=loss_weight)

    # 1) mean, weighted
    out_mean = jax.block_until_ready(
        loss_mod(pred, target, weight=weight, avg_factor=avg_factor))
    ref_mean = loss_weight * jnp.sum(_reference_elem(pred, target, weight)) / avg_factor
    assert jnp.allclose(out_mean, ref_mean, rtol=1e-5, atol=1e-5), (out_mean, ref_mean)

    # 2) mean, no weight (weight stream dropped, in-kernel iota pad mask)
    out_mean_nw = jax.block_until_ready(loss_mod(pred, target, avg_factor=avg_factor))
    ref_mean_nw = loss_weight * jnp.sum(_reference_elem(pred, target)) / avg_factor
    assert jnp.allclose(out_mean_nw, ref_mean_nw, rtol=1e-5, atol=1e-5)

    # 3) 'none', weighted (loss_weight folded as a compile-time constant)
    out_none = jax.block_until_ready(
        loss_mod(pred, target, weight=weight, avg_factor=avg_factor,
                 reduction_override='none'))
    ref_none = loss_weight * _reference_elem(pred, target, weight)
    assert out_none.shape == (n1, d1)
    assert jnp.allclose(out_none, ref_none, rtol=1e-5, atol=1e-5)

    # 4) Multi-block / two-core mean path: grid (2, 2) with padded rows,
    #    both with and without the weight stream.
    n2, d2 = 40, 64
    pred2 = jax.random.normal(k4, (n2, d2, c1), jnp.float32)
    target2 = jax.random.normal(k5, (n2, d2, c1), jnp.float32)
    weight2 = jax.random.uniform(k6, (n2, d2), jnp.float32)
    af2 = float(n2 * d2)
    out2 = jax.block_until_ready(
        pts_dir_cos_loss(pred2, target2, weight=weight2, reduction='mean',
                         avg_factor=af2, loss_weight=1.0, max_block_rows=8))
    ref2 = jnp.sum(_reference_elem(pred2, target2, weight2)) / af2
    assert jnp.allclose(out2, ref2, rtol=1e-5, atol=1e-5), (out2, ref2)

    out2_nw = jax.block_until_ready(
        pts_dir_cos_loss(pred2, target2, reduction='mean',
                         avg_factor=af2, loss_weight=1.0, max_block_rows=8))
    ref2_nw = jnp.sum(_reference_elem(pred2, target2)) / af2
    assert jnp.allclose(out2_nw, ref2_nw, rtol=1e-5, atol=1e-5), (out2_nw, ref2_nw)

    # 5) bf16 inputs streamed at 16-bit, computed in f32 in-kernel.
    pred_bf = pred.astype(jnp.bfloat16)
    target_bf = target.astype(jnp.bfloat16)
    out_bf = jax.block_until_ready(
        pts_dir_cos_loss(pred_bf, target_bf, reduction='mean',
                         avg_factor=avg_factor, loss_weight=1.0))
    ref_bf = jnp.sum(_reference_elem(pred_bf, target_bf)) / avg_factor
    assert jnp.allclose(out_bf, ref_bf, rtol=1e-4, atol=1e-4), (out_bf, ref_bf)

    # 6) Lane-aligned 'none' path (N*D % 128 == 0 -> no post-kernel slice copy).
    n3, d3 = 4, 256
    pred3 = jax.random.normal(jax.random.PRNGKey(7), (n3, d3, c1), jnp.float32)
    target3 = jax.random.normal(jax.random.PRNGKey(8), (n3, d3, c1), jnp.float32)
    out3 = jax.block_until_ready(
        pts_dir_cos_loss(pred3, target3, reduction='none', avg_factor=1.0,
                         loss_weight=1.0))
    ref3 = _reference_elem(pred3, target3)
    assert out3.shape == (n3, d3)
    assert jnp.allclose(out3, ref3, rtol=1e-5, atol=1e-5)

    print("KERNEL_OK")
</pallas_src>

<mosaic_0001>
module attributes {stable_mosaic.version = 11 : i64} {
  func.func @_mean_kernel_w(%arg0: i32, %arg1: i32, %arg2: memref<2x2x8x128xf32, #tpu.memory_space<vmem>>, %arg3: memref<8x128xf32, #tpu.memory_space<vmem>>, %arg4: memref<8x128xf32, #tpu.memory_space<vmem>>) attributes {dimension_semantics = [#tpu.dimension_semantics<parallel>, #tpu.dimension_semantics<arbitrary>], iteration_bounds = array<i64: 1, 1>, scalar_prefetch = 0 : i64, scratch_operands = 0 : i64, tpu.core_type = #tpu.core_type<tc>, window_params = [{transform_indices = @transform_0, window_bounds = array<i64: 2, 2, 8, 128>}, {transform_indices = @transform_1, window_bounds = array<i64: 8, 128>}, {transform_indices = @transform_2, window_bounds = array<i64: 8, 128>}]} {
    %c0_i32 = arith.constant 0 : i32
    %0 = arith.cmpi eq, %arg1, %c0_i32 : i32
    %1 = arith.extui %0 : i1 to i32
    %c0_i32_0 = arith.constant 0 : i32
    %2 = arith.cmpi ne, %1, %c0_i32_0 : i32
    scf.if %2 {
      %cst_23 = arith.constant 0.000000e+00 : f32
      %35 = vector.broadcast %cst_23 : f32 to vector<8x128xf32>
      %c0_24 = arith.constant 0 : index
      %c0_25 = arith.constant 0 : index
      %36 = vector.load %arg4[%c0_24, %c0_25] : memref<8x128xf32, #tpu.memory_space<vmem>>, vector<8x128xf32>
      tpu.vector_store %arg4[%c0_24, %c0_25], %35 {strides = array<i32>} : memref<8x128xf32, #tpu.memory_space<vmem>>, vector<8x128xf32>,
    } else {
    }
    %c0 = arith.constant 0 : index
    %c0_1 = arith.constant 0 : index
    %c0_2 = arith.constant 0 : index
    %c0_3 = arith.constant 0 : index
    %3 = vector.load %arg2[%c0, %c0_1, %c0_2, %c0_3] : memref<2x2x8x128xf32, #tpu.memory_space<vmem>>, vector<1x1x8x128xf32>
    %4 = vector.shape_cast %3 : vector<1x1x8x128xf32> to vector<8x128xf32>
    %c1 = arith.constant 1 : index
    %c0_4 = arith.constant 0 : index
    %c0_5 = arith.constant 0 : index
    %c0_6 = arith.constant 0 : index
    %5 = vector.load %arg2[%c1, %c0_4, %c0_5, %c0_6] : memref<2x2x8x128xf32, #tpu.memory_space<vmem>>, vector<1x1x8x128xf32>
    %6 = vector.shape_cast %5 : vector<1x1x8x128xf32> to vector<8x128xf32>
    %7 = arith.mulf %4, %6 : vector<8x128xf32>
    %8 = arith.mulf %4, %4 : vector<8x128xf32>
    %9 = arith.mulf %6, %6 : vector<8x128xf32>
    %c0_7 = arith.constant 0 : index
    %c1_8 = arith.constant 1 : index
    %c0_9 = arith.constant 0 : index
    %c0_10 = arith.constant 0 : index
    %10 = vector.load %arg2[%c0_7, %c1_8, %c0_9, %c0_10] : memref<2x2x8x128xf32, #tpu.memory_space<vmem>>, vector<1x1x8x128xf32>
    %11 = vector.shape_cast %10 : vector<1x1x8x128xf32> to vector<8x128xf32>
    %c1_11 = arith.constant 1 : index
    %c1_12 = arith.constant 1 : index
    %c0_13 = arith.constant 0 : index
    %c0_14 = arith.constant 0 : index
    %12 = vector.load %arg2[%c1_11, %c1_12, %c0_13, %c0_14] : memref<2x2x8x128xf32, #tpu.memory_space<vmem>>, vector<1x1x8x128xf32>
    %13 = vector.shape_cast %12 : vector<1x1x8x128xf32> to vector<8x128xf32>
    %14 = arith.mulf %11, %13 : vector<8x128xf32>
    %15 = arith.addf %7, %14 : vector<8x128xf32>
    %16 = arith.mulf %11, %11 : vector<8x128xf32>
    %17 = arith.addf %8, %16 : vector<8x128xf32>
    %18 = arith.mulf %13, %13 : vector<8x128xf32>
    %19 = arith.addf %9, %18 : vector<8x128xf32>
    %cst = arith.constant 9.99999996E-13 : f32
    %20 = vector.broadcast %cst : f32 to vector<8x128xf32>
    %21 = arith.addf %17, %20 : vector<8x128xf32>
    %22 = math.rsqrt %21 : vector<8x128xf32>
    %23 = arith.mulf %15, %22 : vector<8x128xf32>
    %cst_15 = arith.constant 9.99999996E-13 : f32
    %24 = vector.broadcast %cst_15 : f32 to vector<8x128xf32>
    %25 = arith.addf %19, %24 : vector<8x128xf32>
    %26 = math.rsqrt %25 : vector<8x128xf32>
    %27 = arith.mulf %23, %26 : vector<8x128xf32>
    %cst_16 = arith.constant 1.000000e+00 : f32
    %28 = vector.broadcast %cst_16 : f32 to vector<8x128xf32>
    %29 = arith.subf %28, %27 : vector<8x128xf32>
    %c0_17 = arith.constant 0 : index
    %c0_18 = arith.constant 0 : index
    %30 = vector.load %arg3[%c0_17, %c0_18] : memref<8x128xf32, #tpu.memory_space<vmem>>, vector<8x128xf32>
    %31 = arith.mulf %29, %30 : vector<8x128xf32>
    %c0_19 = arith.constant 0 : index
    %c0_20 = arith.constant 0 : index
    %32 = vector.load %arg4[%c0_19, %c0_20] : memref<8x128xf32, #tpu.memory_space<vmem>>, vector<8x128xf32>
    %33 = arith.addf %32, %31 : vector<8x128xf32>
    %c0_21 = arith.constant 0 : index
    %c0_22 = arith.constant 0 : index
    %34 = vector.load %arg4[%c0_21, %c0_22] : memref<8x128xf32, #tpu.memory_space<vmem>>, vector<8x128xf32>
    tpu.vector_store %arg4[%c0_21, %c0_22], %33 {strides = array<i32>} : memref<8x128xf32, #tpu.memory_space<vmem>>, vector<8x128xf32>,
    return
  }
  func.func @transform_0(%arg0: i32, %arg1: i32) -> (i32, i32, i32, i32) {
    %c1_i32 = arith.constant 1 : i32
    %0 = arith.muli %arg0, %c1_i32 : i32
    %1 = arith.addi %0, %arg1 : i32
    %c0_i32 = arith.constant 0 : i32
    %c0_i32_0 = arith.constant 0 : i32
    %c0_i32_1 = arith.constant 0 : i32
    %c0_i32_2 = arith.constant 0 : i32
    return %c0_i32, %c0_i32_0, %1, %c0_i32_1 : i32, i32, i32, i32
  }
  func.func @transform_1(%arg0: i32, %arg1: i32) -> (i32, i32) {
    %c1_i32 = arith.constant 1 : i32
    %0 = arith.muli %arg0, %c1_i32 : i32
    %1 = arith.addi %0, %arg1 : i32
    %c0_i32 = arith.constant 0 : i32
    %c0_i32_0 = arith.constant 0 : i32
    return %1, %c0_i32 : i32, i32
  }
  func.func @transform_2(%arg0: i32, %arg1: i32) -> (i32, i32) {
    %c0_i32 = arith.constant 0 : i32
    %c0_i32_0 = arith.constant 0 : i32
    return %arg0, %c0_i32 : i32, i32
  }
}

</mosaic_0001>

<bundles_post_ra>
// kernel: tpu_custom_call.1
= control target key start
LH: loop header
LB: loop body
LE: loop exit
PB: predicated region body
PF: predicated region fallthrough
CT: control target
= control target key end

     0   :  { %7 = vsyncpa [#allocation3], 0  ;;  %s233_s0 = inlined_call_operand.hbm [shape: f32[2,2,8,128], index: 0, kind: input, shape index: {}]   ;;  %s234_s1 = inlined_call_operand.hbm [shape: f32[8,128], index: 1, kind: input, shape index: {}]   ;;  %s235_s2 = inlined_call_operand.hbm [shape: f32[8,128], index: 2, kind: output, shape index: {}]  }
   0x1   :  { %8 = vsyncpa [#allocation6], 0 }
   0x2   :  { %9 = vsyncpa [#allocation4], 0  ;;  %s177_s9 = smov [#allocation2]   ;;  %s105_s13 = scalar_lea.hbm %s233_s0, 512 }
   0x3   :  { %s18_s10 = sshll.u32 %s177_s9, 4  ;;  %p106_p0 = scmp.ne.s32.totalorder %s233_s0, %s105_s13  ;;  %s19_s10 = int_to_ptr.vmem [resolvable:$true] %s18_s10 }
   0x4   :  { %p109_p1 = scmp.lt.u32.totalorder %s105_s13, %s233_s0 }
   0x6   :  { %p111_p2 = pnand %p109_p1, %p106_p0 }
   0x8   :  { %114 = shalt.err (!%p111_p2)
}
   0x9   :  { %s115_s18 = scalar_lea.vmem %s19_s10, 512  ;;  %p120_p4 = scmp.lt.s32.totalorder %s19_s10, %s19_s10 }
   0xa   :  { %p116_p3 = scmp.ne.s32.totalorder %s19_s10, %s115_s18  ;;  %p121_p5 = scmp.lt.s32.totalorder %s115_s18, %s115_s18 }
   0xc   :  { %p122_p6 = por %p121_p5, %p120_p4 }
   0xe   :  { %p123_p7 = pnand %p122_p6, %p116_p3 }
  0x10   :  { %126 = shalt.err (!%p123_p7)
}
  0x11   :  { %s178_s19 = smov 128   ;;  %s179_s20 = smov 8  }
  0x12   :  { %24 = dma.hbm_to_vmem [thread:$0]  %s233_s0, 512, %s19_s10, [#allocation3], %s178_s19, %s178_s19, %s179_s20  }
  0x13   :  { %s180_s23 = smov [#allocation5]   ;;  %s127_s27 = scalar_lea.hbm %s234_s1, 128 }
  0x14   :  { %s34_s24 = sshll.u32 %s180_s23, 4  ;;  %p128_p8 = scmp.ne.s32.totalorder %s234_s1, %s127_s27  ;;  %s35_s24 = int_to_ptr.vmem [resolvable:$true] %s34_s24 }
  0x15   :  { %p131_p9 = scmp.lt.u32.totalorder %s127_s27, %s234_s1 }
  0x17   :  { %p133_p10 = pnand %p131_p9, %p128_p8 }
  0x19   :  { %136 = shalt.err (!%p133_p10)
}
  0x1a   :  { %s137_s4 = scalar_lea.vmem %s35_s24, 128  ;;  %p142_p12 = scmp.lt.s32.totalorder %s35_s24, %s35_s24 }
  0x1b   :  { %p138_p11 = scmp.ne.s32.totalorder %s35_s24, %s137_s4  ;;  %p143_p13 = scmp.lt.s32.totalorder %s137_s4, %s137_s4 }
  0x1d   :  { %p144_p0 = por %p143_p13, %p142_p12 }
  0x1f   :  { %p145_p1 = pnand %p144_p0, %p138_p11 }
  0x21   :  { %148 = shalt.err (!%p145_p1)
}
  0x22   :  { %37 = dma.hbm_to_vmem [thread:$0]  %s234_s1, 128, %s35_s24, [#allocation6]  }
  0x23   :  { %171 = dma.done.wait [#allocation3], 512  }
  0x24   :  { %172 = vsyncadd [#allocation3], 4294966784 }
  0x25   :  { %173 = dma.done.wait [#allocation6], 128  }
  0x26   :  { %174 = vsyncadd [#allocation6], 4294967168  ;;  %v51_v0 = vld [vmem:[#allocation2] sm:$0xff]  ;;  %v53_v1 = vld [vmem:[#allocation2 + $0x10] sm:$0xff]  ;;  %s181_s1 = smov [#allocation7]  }
  0x27   :  { %v58_v2 = vld [vmem:[#allocation2 + $0x8] sm:$0xff]  ;;  %v55_v3 = vmul.f32 %v51_v0, %v51_v0  ;;  %v56_v4 = vmul.f32 %v53_v1, %v53_v1  ;;  %v60_v5 = vld [vmem:[#allocation2 + $0x18] sm:$0xff]  ;;  %v54_v12 = vmul.f32 %v53_v1, %v51_v0  ;;  %v74_v19 = vld [vmem:[#allocation5] sm:$0xff]  ;;  %s85_s6 = sshll.u32 %s181_s1, 4  ;;  %s86_s6 = int_to_ptr.vmem [resolvable:$true] %s85_s6 }
  0x28   :  { %v63_v6 = vmul.f32 %v58_v2, %v58_v2  ;;  %v65_v7 = vmul.f32 %v60_v5, %v60_v5  ;;  %v61_v13 = vmul.f32 %v60_v5, %v58_v2  ;;  %s149_s7 = scalar_lea.vmem %s86_s6, 128  ;;  %p154_p3 = scmp.lt.s32.totalorder %s86_s6, %s86_s6 }
  0x29   :  { %p150_p2 = scmp.ne.s32.totalorder %s86_s6, %s149_s7  ;;  %p155_p4 = scmp.lt.s32.totalorder %s149_s7, %s149_s7 }
  0x2a   :  { %v64_v8 = vadd.f32 %v63_v6, %v55_v3  ;;  %v66_v9 = vadd.f32 %v65_v7, %v56_v4  ;;  %v62_v14 = vadd.f32 %v61_v13, %v54_v12 }
  0x2b   :  { %p156_p5 = por %p155_p4, %p154_p3 }
  0x2c   :  { %v67_v10 = vadd.f32 1e-12, %v64_v8  ;;  %v70_v11 = vadd.f32 1e-12, %v66_v9 }
  0x2d   :  { %p157_p6 = pnand %p156_p5, %p150_p2 }
  0x2e   :  { %101 = vrsqrt.f32 %v67_v10 }
  0x2f   :  { %103 = vrsqrt.f32 %v70_v11 }
  0x38   :  { %v102_v15 = vpop.eup %101 }
  0x39   :  { %v104_v16 = vpop.eup %103  ;;  %v69_v17 = vmul.f32 %v102_v15, %v62_v14 }
  0x3b   :  { %v72_v18 = vmul.f32 %v104_v16, %v69_v17 }
  0x3d   :  { %v73_v20 = vsub.f32 1.0, %v72_v18 }
  0x3f   :  { %v75_v21 = vmul.f32 %v74_v19, %v73_v20 }
  0x41   :  { %78 = vst [vmem:[#allocation7] sm:$0xff] %v75_v21 }
  0x42   :  { %160 = shalt.err (!%p157_p6)
}
  0x43   :  { %s161_s10 = scalar_lea.hbm %s235_s2, 128 }
  0x44   :  { %p162_p7 = scmp.ne.s32.totalorder %s235_s2, %s161_s10  ;;  %p165_p8 = scmp.lt.u32.totalorder %s161_s10, %s235_s2 }
  0x46   :  { %p167_p9 = pnand %p165_p8, %p162_p7 }
  0x48   :  { %170 = shalt.err (!%p167_p9)
}
  0x49   :  { %88 = dma.vmem_to_hbm [thread:$0]  %s86_s6, 128, %s235_s2, [#allocation4]  }
  0x4a   :  { %175 = dma.done.wait [#allocation4], 128  }
  0x4b   :  { %176 = vsyncadd [#allocation4], 4294967168 }
  0x4c   :  { %92 = vsyncpa [#allocation3], 1 }
  0x4d   :  { %93 = vsyncpa [#allocation6], 1 }
  0x4e   :  { %94 = vsyncpa [#allocation4], 1 }

</bundles_post_ra>
